<compile_context>
chip_gen: v7x
topology: tpu7x:2x2x1
jax: 0.10.0
libtpu: 0.0.40
codegen_flags: <defaults>
</compile_context>

<pallas_src>
import jax
import jax.numpy as jnp
from jax.experimental import pallas as pl
from jax.experimental.pallas import tpu as pltpu

HIDDEN = 128


def mlp_kernel(x_ref,
               w1_ref, b1_ref, w2_ref, b2_ref, w3_ref, b3_ref,
               w4_ref, b4_ref, w5_ref, b5_ref,
               o_ref):
    """One batch tile: 4x (bf16 MXU matmul + f32 bias/ReLU) + lane-reduce head."""
    # Layer 1: cast the input tile to bf16 right at the dot input (no-op if the
    # caller already supplies bf16).
    h = jnp.dot(x_ref[...].astype(jnp.bfloat16), w1_ref[...],
                preferred_element_type=jnp.float32)
    h = jnp.maximum(h + b1_ref[...], 0.0)

    # Layers 2-4: bf16 MXU matmuls, f32 epilogues (free filler under MXU time).
    for w_ref, b_ref in ((w2_ref, b2_ref), (w3_ref, b3_ref), (w4_ref, b4_ref)):
        h = jnp.dot(h.astype(jnp.bfloat16), w_ref[...],
                    preferred_element_type=jnp.float32)
        h = jnp.maximum(h + b_ref[...], 0.0)

    # Layer 5 (128 -> 1): broadcast the (1,128) weight row and reduce lanes
    # (VPU/XLU) instead of a 1-result-lane MXU matmul.
    z = jnp.sum(h * w5_ref[...], axis=-1, keepdims=True) + b5_ref[...]
    o_ref[...] = jax.nn.sigmoid(z)


def _round_up(n, m):
    return ((n + m - 1) // m) * m


def _cdiv(a, b):
    return (a + b - 1) // b


def _select_tiling(batch, in_dim, x_itemsize, *, tb_max=2048):
    """Pick (padded_batch, tb, n_steps) per the perf-review policy."""
    # Pad only to the sublane multiple; never round batch up to a tb multiple.
    padded8 = _round_up(max(batch, 8), 8)

    # v7x has 2 TensorCores: keep at least 2 grid steps whenever batch allows.
    if padded8 >= 16:
        tb_max = min(tb_max, _round_up(_cdiv(padded8, 2), 8))

    # VMEM budget guard: x tile (up to triple-buffered) + live f32
    # intermediates + double-buffered output + resident weights must stay under
    # the smallest default scoped-VMEM limit (v5e: 16 MiB) with headroom.
    budget = 12 * 1024 * 1024
    weight_bytes = 2 * (in_dim * HIDDEN * 2 + 3 * HIDDEN * HIDDEN * 2
                        + 4 * HIDDEN * 4 + HIDDEN * 4 + 4)

    def vmem_bytes(tb):
        return (3 * tb * in_dim * x_itemsize   # x buffers (Buffered(3) worst case)
                + 3 * tb * HIDDEN * 4          # f32 intermediates / live vregs
                + 2 * tb * 4                   # output double-buffer
                + weight_bytes)

    while tb_max > 8 and vmem_bytes(tb_max) > budget:
        tb_max = max(8, _round_up(tb_max // 2, 8))

    n_steps = _cdiv(padded8, tb_max)
    if padded8 >= 16 and n_steps > 1 and n_steps % 2 == 1:
        n_steps += 1                            # even step count -> both v7x TCs busy
    tb = _round_up(_cdiv(padded8, n_steps), 8)  # balance rows across steps
    padded = tb * n_steps
    return padded, tb, n_steps


def net_forward(x, params, *, tb_max=2048):
    """x: (batch, input_dim) float32 or bfloat16.  Returns (batch, 1) float32."""
    batch, in_dim = x.shape
    (w1, b1), (w2, b2), (w3, b3), (w4, b4), (w5r, b5) = params

    x_itemsize = jnp.dtype(x.dtype).itemsize
    padded, tb, n_steps = _select_tiling(batch, in_dim, x_itemsize, tb_max=tb_max)
    if padded != batch:
        x = jnp.pad(x, ((0, padded - batch), (0, 0)))
    grid = (n_steps,)

    const = lambda i: (0, 0)        # weights/biases stay resident across steps
    batch_map = lambda i: (i, 0)    # batch-tiled input / output

    if in_dim >= 512:
        # x-DMA-bound regime: deeper buffering on x only (weights are resident,
        # so extra depth there would be wasted VMEM).
        x_spec = pl.BlockSpec((tb, in_dim), batch_map,
                              pipeline_mode=pl.Buffered(3))
    else:
        x_spec = pl.BlockSpec((tb, in_dim), batch_map)

    in_specs = [
        x_spec,                                      # x (f32 or bf16)
        pl.BlockSpec((in_dim, HIDDEN), const),       # w1 (bf16)
        pl.BlockSpec((1, HIDDEN), const),            # b1 (f32)
        pl.BlockSpec((HIDDEN, HIDDEN), const),       # w2 (bf16)
        pl.BlockSpec((1, HIDDEN), const),            # b2
        pl.BlockSpec((HIDDEN, HIDDEN), const),       # w3 (bf16)
        pl.BlockSpec((1, HIDDEN), const),            # b3
        pl.BlockSpec((HIDDEN, HIDDEN), const),       # w4 (bf16)
        pl.BlockSpec((1, HIDDEN), const),            # b4
        pl.BlockSpec((1, HIDDEN), const),            # w5 row (f32)
        pl.BlockSpec((1, 1), const),                 # b5
    ]
    out_spec = pl.BlockSpec((tb, 1), batch_map)

    weight_bytes = (in_dim * HIDDEN * 2 + 3 * HIDDEN * HIDDEN * 2 +
                    4 * HIDDEN * 4 + HIDDEN * 4 + 4)
    cost = pl.CostEstimate(
        flops=2 * padded * (in_dim * HIDDEN + 3 * HIDDEN * HIDDEN + HIDDEN),
        transcendentals=2 * padded,   # sigmoid ~= exp + reciprocal per element
        bytes_accessed=padded * in_dim * x_itemsize + weight_bytes + padded * 4,
    )

    out = pl.pallas_call(
        mlp_kernel,
        out_shape=jax.ShapeDtypeStruct((padded, 1), jnp.float32),
        grid=grid,
        in_specs=in_specs,
        out_specs=out_spec,
        compiler_params=pltpu.CompilerParams(
            dimension_semantics=("parallel",)),
        cost_estimate=cost,
    )(x, w1, b1, w2, b2, w3, b3, w4, b4, w5r, b5)
    # TODO(synk): if profiling ever shows the (tb,1) masked vst store path
    # exposed (wall - compute gap), switch to a lane-dense (padded//128, 128)
    # output packed via an XLU transpose in the kernel tail and reshape here;
    # kept (batch, 1) since the store is hidden under MXU time at this size.
    return out[:batch]


def init_params(key, input_dim):
    """PyTorch-style uniform(+/- 1/sqrt(fan_in)) init, kernel-ready layout.

    Hidden weights are (in_features, out_features) bf16 (native MXU dtype,
    half the HBM bytes); biases stay f32 (1, out).  The final layer is stored
    as a (1, 128) f32 row for the lane reduction.
    """
    dims = [(input_dim, HIDDEN), (HIDDEN, HIDDEN), (HIDDEN, HIDDEN),
            (HIDDEN, HIDDEN), (HIDDEN, 1)]
    params = []
    for li, (fan_in, fan_out) in enumerate(dims):
        key, kw, kb = jax.random.split(key, 3)
        bound = 1.0 / jnp.sqrt(jnp.float32(fan_in))
        w = jax.random.uniform(kw, (fan_in, fan_out), jnp.float32, -bound, bound)
        b = jax.random.uniform(kb, (1, fan_out), jnp.float32, -bound, bound)
        if li < 4:
            params.append((w.astype(jnp.bfloat16), b))
        else:
            params.append((w.T, b))        # (1, 128) f32 row + (1, 1) f32 bias
    return params


def reference_forward(x, params):
    """Pure-JAX reference with matching precision semantics (bf16 dot, f32 acc)."""
    (w1, b1), (w2, b2), (w3, b3), (w4, b4), (w5r, b5) = params
    h = x
    for w, b in ((w1, b1), (w2, b2), (w3, b3), (w4, b4)):
        h = jnp.dot(h.astype(jnp.bfloat16), w,
                    preferred_element_type=jnp.float32)
        h = jnp.maximum(h + b, 0.0)
    z = jnp.sum(h * w5r, axis=-1, keepdims=True) + b5
    return jax.nn.sigmoid(z)


if __name__ == "__main__":
    key = jax.random.PRNGKey(0)
    k_param, k_x, k_x2 = jax.random.split(key, 3)

    batch, input_dim = 8, 32
    params = init_params(k_param, input_dim)
    x = jax.random.normal(k_x, (batch, input_dim), jnp.float32)

    out = jax.block_until_ready(net_forward(x, params))
    ref = reference_forward(x, params)
    assert out.shape == (batch, 1), out.shape
    assert jnp.allclose(out, ref, atol=5e-3, rtol=0), (out, ref)

    # Second check: awkward batch that exercises the multi-step (>=2, even)
    # grid and the pad-to-8 / balanced-tb policy.
    batch2 = 300
    x2 = jax.random.normal(k_x2, (batch2, input_dim), jnp.float32)
    out2 = jax.block_until_ready(net_forward(x2, params))
    ref2 = reference_forward(x2, params)
    assert out2.shape == (batch2, 1), out2.shape
    assert jnp.allclose(out2, ref2, atol=5e-3, rtol=0)

    print("KERNEL_OK")
</pallas_src>

<mosaic_0001>
module attributes {stable_mosaic.version = 11 : i64} {
  func.func @mlp_kernel(%arg0: i32, %arg1: memref<8x32xf32, #tpu.memory_space<vmem>>, %arg2: memref<32x128xbf16, #tpu.memory_space<vmem>>, %arg3: memref<1x128xf32, #tpu.memory_space<vmem>>, %arg4: memref<128x128xbf16, #tpu.memory_space<vmem>>, %arg5: memref<1x128xf32, #tpu.memory_space<vmem>>, %arg6: memref<128x128xbf16, #tpu.memory_space<vmem>>, %arg7: memref<1x128xf32, #tpu.memory_space<vmem>>, %arg8: memref<128x128xbf16, #tpu.memory_space<vmem>>, %arg9: memref<1x128xf32, #tpu.memory_space<vmem>>, %arg10: memref<1x128xf32, #tpu.memory_space<vmem>>, %arg11: memref<1x1xf32, #tpu.memory_space<vmem>>, %arg12: memref<8x1xf32, #tpu.memory_space<vmem>>) attributes {dimension_semantics = [#tpu.dimension_semantics<parallel>], iteration_bounds = array<i64: 1>, scalar_prefetch = 0 : i64, scratch_operands = 0 : i64, tpu.core_type = #tpu.core_type<tc>, window_params = [{transform_indices = @transform_0, window_bounds = array<i64: 8, 32>}, {pipeline_mode = #tpu.pipeline_mode<synchronous>, transform_indices = @transform_1, window_bounds = array<i64: 32, 128>}, {pipeline_mode = #tpu.pipeline_mode<synchronous>, transform_indices = @transform_2, window_bounds = array<i64: 1, 128>}, {pipeline_mode = #tpu.pipeline_mode<synchronous>, transform_indices = @transform_3, window_bounds = array<i64: 128, 128>}, {pipeline_mode = #tpu.pipeline_mode<synchronous>, transform_indices = @transform_4, window_bounds = array<i64: 1, 128>}, {pipeline_mode = #tpu.pipeline_mode<synchronous>, transform_indices = @transform_5, window_bounds = array<i64: 128, 128>}, {pipeline_mode = #tpu.pipeline_mode<synchronous>, transform_indices = @transform_6, window_bounds = array<i64: 1, 128>}, {pipeline_mode = #tpu.pipeline_mode<synchronous>, transform_indices = @transform_7, window_bounds = array<i64: 128, 128>}, {pipeline_mode = #tpu.pipeline_mode<synchronous>, transform_indices = @transform_8, window_bounds = array<i64: 1, 128>}, {pipeline_mode = #tpu.pipeline_mode<synchronous>, transform_indices = @transform_9, window_bounds = array<i64: 1, 128>}, {pipeline_mode = #tpu.pipeline_mode<synchronous>, transform_indices = @transform_10, window_bounds = array<i64: 1, 1>}, {transform_indices = @transform_11, window_bounds = array<i64: 8, 1>}]} {
    %c0 = arith.constant 0 : index
    %c0_0 = arith.constant 0 : index
    %0 = vector.load %arg1[%c0, %c0_0] : memref<8x32xf32, #tpu.memory_space<vmem>>, vector<8x32xf32>
    %1 = arith.truncf %0 : vector<8x32xf32> to vector<8x32xbf16>
    %c0_1 = arith.constant 0 : index
    %c0_2 = arith.constant 0 : index
    %2 = vector.load %arg2[%c0_1, %c0_2] : memref<32x128xbf16, #tpu.memory_space<vmem>>, vector<32x128xbf16>
    %cst = arith.constant dense<0.000000e+00> : vector<8x128xf32>
    %3 = tpu.matmul %1, %2, %cst {dimension_numbers = #tpu.dot_dimension_numbers<[1], [0], [0], [1], [0, 0, 1, 1], [], []>} : vector<8x32xbf16>, vector<32x128xbf16>, vector<8x128xf32> -> vector<8x128xf32>
    %c0_3 = arith.constant 0 : index
    %c0_4 = arith.constant 0 : index
    %4 = vector.load %arg3[%c0_3, %c0_4] : memref<1x128xf32, #tpu.memory_space<vmem>>, vector<1x128xf32>
    %5 = vector.broadcast %4 : vector<1x128xf32> to vector<8x128xf32>
    %6 = arith.addf %3, %5 : vector<8x128xf32>
    %cst_5 = arith.constant 0.000000e+00 : f32
    %7 = vector.broadcast %cst_5 : f32 to vector<8x128xf32>
    %8 = arith.maximumf %6, %7 : vector<8x128xf32>
    %9 = arith.truncf %8 : vector<8x128xf32> to vector<8x128xbf16>
    %c0_6 = arith.constant 0 : index
    %c0_7 = arith.constant 0 : index
    %10 = vector.load %arg4[%c0_6, %c0_7] : memref<128x128xbf16, #tpu.memory_space<vmem>>, vector<128x128xbf16>
    %cst_8 = arith.constant dense<0.000000e+00> : vector<8x128xf32>
    %11 = tpu.matmul %9, %10, %cst_8 {dimension_numbers = #tpu.dot_dimension_numbers<[1], [0], [0], [1], [0, 0, 1, 1], [], []>} : vector<8x128xbf16>, vector<128x128xbf16>, vector<8x128xf32> -> vector<8x128xf32>
    %c0_9 = arith.constant 0 : index
    %c0_10 = arith.constant 0 : index
    %12 = vector.load %arg5[%c0_9, %c0_10] : memref<1x128xf32, #tpu.memory_space<vmem>>, vector<1x128xf32>
    %13 = vector.broadcast %12 : vector<1x128xf32> to vector<8x128xf32>
    %14 = arith.addf %11, %13 : vector<8x128xf32>
    %cst_11 = arith.constant 0.000000e+00 : f32
    %15 = vector.broadcast %cst_11 : f32 to vector<8x128xf32>
    %16 = arith.maximumf %14, %15 : vector<8x128xf32>
    %17 = arith.truncf %16 : vector<8x128xf32> to vector<8x128xbf16>
    %c0_12 = arith.constant 0 : index
    %c0_13 = arith.constant 0 : index
    %18 = vector.load %arg6[%c0_12, %c0_13] : memref<128x128xbf16, #tpu.memory_space<vmem>>, vector<128x128xbf16>
    %cst_14 = arith.constant dense<0.000000e+00> : vector<8x128xf32>
    %19 = tpu.matmul %17, %18, %cst_14 {dimension_numbers = #tpu.dot_dimension_numbers<[1], [0], [0], [1], [0, 0, 1, 1], [], []>} : vector<8x128xbf16>, vector<128x128xbf16>, vector<8x128xf32> -> vector<8x128xf32>
    %c0_15 = arith.constant 0 : index
    %c0_16 = arith.constant 0 : index
    %20 = vector.load %arg7[%c0_15, %c0_16] : memref<1x128xf32, #tpu.memory_space<vmem>>, vector<1x128xf32>
    %21 = vector.broadcast %20 : vector<1x128xf32> to vector<8x128xf32>
    %22 = arith.addf %19, %21 : vector<8x128xf32>
    %cst_17 = arith.constant 0.000000e+00 : f32
    %23 = vector.broadcast %cst_17 : f32 to vector<8x128xf32>
    %24 = arith.maximumf %22, %23 : vector<8x128xf32>
    %25 = arith.truncf %24 : vector<8x128xf32> to vector<8x128xbf16>
    %c0_18 = arith.constant 0 : index
    %c0_19 = arith.constant 0 : index
    %26 = vector.load %arg8[%c0_18, %c0_19] : memref<128x128xbf16, #tpu.memory_space<vmem>>, vector<128x128xbf16>
    %cst_20 = arith.constant dense<0.000000e+00> : vector<8x128xf32>
    %27 = tpu.matmul %25, %26, %cst_20 {dimension_numbers = #tpu.dot_dimension_numbers<[1], [0], [0], [1], [0, 0, 1, 1], [], []>} : vector<8x128xbf16>, vector<128x128xbf16>, vector<8x128xf32> -> vector<8x128xf32>
    %c0_21 = arith.constant 0 : index
    %c0_22 = arith.constant 0 : index
    %28 = vector.load %arg9[%c0_21, %c0_22] : memref<1x128xf32, #tpu.memory_space<vmem>>, vector<1x128xf32>
    %29 = vector.broadcast %28 : vector<1x128xf32> to vector<8x128xf32>
    %30 = arith.addf %27, %29 : vector<8x128xf32>
    %cst_23 = arith.constant 0.000000e+00 : f32
    %31 = vector.broadcast %cst_23 : f32 to vector<8x128xf32>
    %32 = arith.maximumf %30, %31 : vector<8x128xf32>
    %c0_24 = arith.constant 0 : index
    %c0_25 = arith.constant 0 : index
    %33 = vector.load %arg10[%c0_24, %c0_25] : memref<1x128xf32, #tpu.memory_space<vmem>>, vector<1x128xf32>
    %34 = vector.broadcast %33 : vector<1x128xf32> to vector<8x128xf32>
    %35 = arith.mulf %32, %34 : vector<8x128xf32>
    %cst_26 = arith.constant dense<0.000000e+00> : vector<8xf32>
    %36 = vector.multi_reduction <add>, %35, %cst_26 [1] : vector<8x128xf32> to vector<8xf32>
    %37 = vector.shape_cast %36 : vector<8xf32> to vector<8x1xf32>
    %c0_27 = arith.constant 0 : index
    %c0_28 = arith.constant 0 : index
    %38 = vector.load %arg11[%c0_27, %c0_28] : memref<1x1xf32, #tpu.memory_space<vmem>>, vector<1x1xf32>
    %39 = vector.broadcast %38 : vector<1x1xf32> to vector<8x1xf32>
    %40 = arith.addf %37, %39 : vector<8x1xf32>
    %41 = arith.negf %40 : vector<8x1xf32>
    %42 = math.exp %41 : vector<8x1xf32>
    %cst_29 = arith.constant 1.000000e+00 : f32
    %43 = vector.broadcast %cst_29 : f32 to vector<8x1xf32>
    %44 = arith.addf %43, %42 : vector<8x1xf32>
    %45 = arith.divf %43, %44 : vector<8x1xf32>
    %c0_30 = arith.constant 0 : index
    %c0_31 = arith.constant 0 : index
    %46 = vector.load %arg12[%c0_30, %c0_31] : memref<8x1xf32, #tpu.memory_space<vmem>>, vector<8x1xf32>
    tpu.vector_store %arg12[%c0_30, %c0_31], %45 {strides = array<i32>} : memref<8x1xf32, #tpu.memory_space<vmem>>, vector<8x1xf32>,
    return
  }
  func.func @transform_0(%arg0: i32) -> (i32, i32) {
    %c0_i32 = arith.constant 0 : i32
    %c0_i32_0 = arith.constant 0 : i32
    return %arg0, %c0_i32 : i32, i32
  }
  func.func @transform_1(%arg0: i32) -> (i32, i32) {
    %c0_i32 = arith.constant 0 : i32
    %c0_i32_0 = arith.constant 0 : i32
    %c0_i32_1 = arith.constant 0 : i32
    return %c0_i32, %c0_i32_0 : i32, i32
  }
  func.func @transform_2(%arg0: i32) -> (i32, i32) {
    %c0_i32 = arith.constant 0 : i32
    %c0_i32_0 = arith.constant 0 : i32
    %c0_i32_1 = arith.constant 0 : i32
    return %c0_i32, %c0_i32_0 : i32, i32
  }
  func.func @transform_3(%arg0: i32) -> (i32, i32) {
    %c0_i32 = arith.constant 0 : i32
    %c0_i32_0 = arith.constant 0 : i32
    %c0_i32_1 = arith.constant 0 : i32
    return %c0_i32, %c0_i32_0 : i32, i32
  }
  func.func @transform_4(%arg0: i32) -> (i32, i32) {
    %c0_i32 = arith.constant 0 : i32
    %c0_i32_0 = arith.constant 0 : i32
    %c0_i32_1 = arith.constant 0 : i32
    return %c0_i32, %c0_i32_0 : i32, i32
  }
  func.func @transform_5(%arg0: i32) -> (i32, i32) {
    %c0_i32 = arith.constant 0 : i32
    %c0_i32_0 = arith.constant 0 : i32
    %c0_i32_1 = arith.constant 0 : i32
    return %c0_i32, %c0_i32_0 : i32, i32
  }
  func.func @transform_6(%arg0: i32) -> (i32, i32) {
    %c0_i32 = arith.constant 0 : i32
    %c0_i32_0 = arith.constant 0 : i32
    %c0_i32_1 = arith.constant 0 : i32
    return %c0_i32, %c0_i32_0 : i32, i32
  }
  func.func @transform_7(%arg0: i32) -> (i32, i32) {
    %c0_i32 = arith.constant 0 : i32
    %c0_i32_0 = arith.constant 0 : i32
    %c0_i32_1 = arith.constant 0 : i32
    return %c0_i32, %c0_i32_0 : i32, i32
  }
  func.func @transform_8(%arg0: i32) -> (i32, i32) {
    %c0_i32 = arith.constant 0 : i32
    %c0_i32_0 = arith.constant 0 : i32
    %c0_i32_1 = arith.constant 0 : i32
    return %c0_i32, %c0_i32_0 : i32, i32
  }
  func.func @transform_9(%arg0: i32) -> (i32, i32) {
    %c0_i32 = arith.constant 0 : i32
    %c0_i32_0 = arith.constant 0 : i32
    %c0_i32_1 = arith.constant 0 : i32
    return %c0_i32, %c0_i32_0 : i32, i32
  }
  func.func @transform_10(%arg0: i32) -> (i32, i32) {
    %c0_i32 = arith.constant 0 : i32
    %c0_i32_0 = arith.constant 0 : i32
    %c0_i32_1 = arith.constant 0 : i32
    return %c0_i32, %c0_i32_0 : i32, i32
  }
  func.func @transform_11(%arg0: i32) -> (i32, i32) {
    %c0_i32 = arith.constant 0 : i32
    %c0_i32_0 = arith.constant 0 : i32
    return %arg0, %c0_i32 : i32, i32
  }
}

</mosaic_0001>

<bundles_post_ra>
// kernel: tpu_custom_call.1
= control target key start
LH: loop header
LB: loop body
LE: loop exit
PB: predicated region body
PF: predicated region fallthrough
CT: control target
= control target key end

     0   :  { %s1032_s0 = inlined_call_operand.hbm [shape: f32[8,32], index: 0, kind: input, shape index: {}]   ;;  %s1033_s1 = inlined_call_operand.hbm [shape: bf16[32,128], index: 1, kind: input, shape index: {}]   ;;  %s1034_s2 = inlined_call_operand.vmem [shape: f32[1,128], index: 2, kind: input, shape index: {}]   ;;  %s1035_s3 = inlined_call_operand.hbm [shape: bf16[128,128], index: 3, kind: input, shape index: {}]   ;;  %s1036_s4 = inlined_call_operand.vmem [shape: f32[1,128], index: 4, kind: input, shape index: {}]   ;;  %s1037_s5 = inlined_call_operand.hbm [shape: bf16[128,128], index: 5, kind: input, shape index: {}]   ;;  %s1038_s6 = inlined_call_operand.vmem [shape: f32[1,128], index: 6, kind: input, shape index: {}]   ;;  %s1039_s7 = inlined_call_operand.hbm [shape: bf16[128,128], index: 7, kind: input, shape index: {}]   ;;  %s1040_s8 = inlined_call_operand.vmem [shape: f32[1,128], index: 8, kind: input, shape index: {}]   ;;  %s1041_s9 = inlined_call_operand.vmem [shape: f32[1,128], index: 9, kind: input, shape index: {}]   ;;  %s1042_s10 = inlined_call_operand.<no memory space> [shape: f32[1,1], index: 10, kind: input, shape index: {}]   ;;  %s1043_s11 = inlined_call_operand.vmem [shape: f32[8,1], index: 11, kind: output, shape index: {}]  }
   0x1   :  { %v16_v0 = vstv %s1042_s10 }
   0x2   :  { %17 = vst [vmem:[#allocation2] sm:$0x1] %v16_v0 }
   0x3   :  { %18 = vsyncpa [#allocation4], 0 }
   0x4   :  { %19 = vsyncpa [#allocation6], 0 }
   0x5   :  { %20 = vsyncpa [#allocation9], 0  ;;  %s836_s19 = smov [#allocation5]   ;;  %s720_s23 = scalar_lea.hbm %s1033_s1, 256 }
   0x6   :  { %s36_s20 = sshll.u32 %s836_s19, 4  ;;  %p721_p0 = scmp.ne.s32.totalorder %s1033_s1, %s720_s23  ;;  %s37_s20 = int_to_ptr.vmem [resolvable:$true] %s36_s20 }
   0x7   :  { %p724_p1 = scmp.lt.u32.totalorder %s720_s23, %s1033_s1 }
   0x9   :  { %p726_p2 = pnand %p724_p1, %p721_p0 }
   0xb   :  { %729 = shalt.err (!%p726_p2)
}
   0xc   :  { %s730_s10 = scalar_lea.vmem %s37_s20, 256  ;;  %p735_p4 = scmp.lt.s32.totalorder %s37_s20, %s37_s20 }
   0xd   :  { %p731_p3 = scmp.ne.s32.totalorder %s37_s20, %s730_s10  ;;  %p736_p5 = scmp.lt.s32.totalorder %s730_s10, %s730_s10 }
   0xf   :  { %p737_p6 = por %p736_p5, %p735_p4 }
  0x11   :  { %p738_p7 = pnand %p737_p6, %p731_p3 }
  0x13   :  { %741 = shalt.err (!%p738_p7)
}
  0x14   :  { %s837_s28 = smov 64   ;;  %s838_s29 = smov 4  }
  0x15   :  { %42 = dma.hbm_to_vmem [thread:$0]  %s1033_s1, 256, %s37_s20, [#allocation6], %s837_s28, %s837_s28, %s838_s29  }
  0x16   :  { %s839_s13 = smov [#allocation8]   ;;  %s840_s15 = smov [#allocation3]  }
  0x17   :  { %s64_s14 = sshll.u32 %s839_s13, 4  ;;  %s27_s16 = sshll.u32 %s840_s15, 4  ;;  %s65_s14 = int_to_ptr.vmem [resolvable:$true] %s64_s14  ;;  %s28_s16 = int_to_ptr.vmem [resolvable:$true] %s27_s16 }
  0x18   :  { %s742_s19 = scalar_lea.hbm %s1037_s5, 1024 }
  0x19   :  { %p743_p8 = scmp.ne.s32.totalorder %s1037_s5, %s742_s19  ;;  %p746_p9 = scmp.lt.u32.totalorder %s742_s19, %s1037_s5 }
  0x1b   :  { %p748_p10 = pnand %p746_p9, %p743_p8 }
  0x1d   :  { %751 = shalt.err (!%p748_p10)
}
  0x1e   :  { %s752_s1 = scalar_lea.vmem %s65_s14, 1024  ;;  %p757_p12 = scmp.lt.s32.totalorder %s65_s14, %s65_s14 }
  0x1f   :  { %p753_p11 = scmp.ne.s32.totalorder %s65_s14, %s752_s1  ;;  %p758_p13 = scmp.lt.s32.totalorder %s752_s1, %s752_s1 }
  0x21   :  { %p759_p0 = por %p758_p13, %p757_p12 }
  0x23   :  { %p760_p1 = pnand %p759_p0, %p753_p11 }
  0x25   :  { %763 = shalt.err (!%p760_p1)
}
  0x26   :  { %70 = dma.hbm_to_vmem [thread:$0]  %s1037_s5, 1024, %s65_s14, [#allocation9], %s837_s28, %s837_s28, %s838_s29  }
  0x27   :  { %s764_s10 = scalar_lea.hbm %s1032_s0, 128 }
  0x28   :  { %p765_p2 = scmp.ne.s32.totalorder %s1032_s0, %s764_s10  ;;  %p768_p3 = scmp.lt.u32.totalorder %s764_s10, %s1032_s0 }
  0x2a   :  { %p770_p4 = pnand %p768_p3, %p765_p2 }
  0x2c   :  { %773 = shalt.err (!%p770_p4)
}
  0x2d   :  { %s774_s17 = scalar_lea.vmem %s28_s16, 128  ;;  %p779_p6 = scmp.lt.s32.totalorder %s28_s16, %s28_s16 }
  0x2e   :  { %p775_p5 = scmp.ne.s32.totalorder %s28_s16, %s774_s17  ;;  %p780_p7 = scmp.lt.s32.totalorder %s774_s17, %s774_s17 }
  0x30   :  { %p781_p8 = por %p780_p7, %p779_p6 }
  0x32   :  { %p782_p9 = pnand %p781_p8, %p775_p5 }
  0x34   :  { %785 = shalt.err (!%p782_p9)
}
  0x35   :  { %30 = dma.hbm_to_vmem [thread:$0]  %s1032_s0, 128, %s28_s16, [#allocation4]  }
  0x36   :  { %s841_s18 = smov [#allocation7]   ;;  %s842_s21 = smov [#allocation10]  }
  0x37   :  { %s50_s19 = sshll.u32 %s841_s18, 4  ;;  %s78_s22 = sshll.u32 %s842_s21, 4  ;;  %s51_s19 = int_to_ptr.vmem [resolvable:$true] %s50_s19  ;;  %s79_s22 = int_to_ptr.vmem [resolvable:$true] %s78_s22 }
  0x38   :  { %s786_s1 = scalar_lea.hbm %s1035_s3, 1024 }
  0x39   :  { %p787_p10 = scmp.ne.s32.totalorder %s1035_s3, %s786_s1  ;;  %p790_p11 = scmp.lt.u32.totalorder %s786_s1, %s1035_s3 }
  0x3b   :  { %p792_p12 = pnand %p790_p11, %p787_p10 }
  0x3d   :  { %795 = shalt.err (!%p792_p12)
}
  0x3e   :  { %s796_s0 = scalar_lea.vmem %s51_s19, 1024  ;;  %p801_p0 = scmp.lt.s32.totalorder %s51_s19, %s51_s19 }
  0x3f   :  { %p797_p13 = scmp.ne.s32.totalorder %s51_s19, %s796_s0  ;;  %p802_p1 = scmp.lt.s32.totalorder %s796_s0, %s796_s0 }
  0x41   :  { %p803_p2 = por %p802_p1, %p801_p0 }
  0x43   :  { %p804_p3 = pnand %p803_p2, %p797_p13 }
  0x45   :  { %807 = shalt.err (!%p804_p3)
}
  0x46   :  { %56 = dma.hbm_to_vmem [thread:$0]  %s1035_s3, 1024, %s51_s19, [#allocation6], %s837_s28, %s837_s28, %s838_s29  }
  0x47   :  { %s808_s13 = scalar_lea.hbm %s1039_s7, 1024 }
  0x48   :  { %p809_p4 = scmp.ne.s32.totalorder %s1039_s7, %s808_s13  ;;  %p812_p5 = scmp.lt.u32.totalorder %s808_s13, %s1039_s7 }
  0x4a   :  { %p814_p6 = pnand %p812_p5, %p809_p4 }
  0x4c   :  { %817 = shalt.err (!%p814_p6)
}
  0x4d   :  { %s818_s18 = scalar_lea.vmem %s79_s22, 1024  ;;  %p823_p8 = scmp.lt.s32.totalorder %s79_s22, %s79_s22 }
  0x4e   :  { %p819_p7 = scmp.ne.s32.totalorder %s79_s22, %s818_s18  ;;  %p824_p9 = scmp.lt.s32.totalorder %s818_s18, %s818_s18 }
  0x50   :  { %p825_p10 = por %p824_p9, %p823_p8 }
  0x52   :  { %p826_p11 = pnand %p825_p10, %p819_p7 }
  0x54   :  { %829 = shalt.err (!%p826_p11)
}
  0x55   :  { %84 = dma.hbm_to_vmem [thread:$0]  %s1039_s7, 1024, %s79_s22, [#allocation9], %s837_s28, %s837_s28, %s838_s29  }
  0x56   :  { %830 = dma.done.wait [#allocation4], 128  }
  0x57   :  { %831 = vsyncadd [#allocation4], 4294967168 }
  0x58   :  { %832 = dma.done.wait [#allocation6], 1280  }
  0x59   :  { %833 = vsyncadd [#allocation6], 4294966016 }
  0x5a   :  { %834 = dma.done.wait [#allocation9], 2048  }
  0x5b   :  { %835 = vsyncadd [#allocation9], 4294965248  ;;  %v843_v1 = vmov 0.0   ;;  %vm844_vm0 = vmmov 0   ;;  %v690_v2 = vld [vmem:[#allocation5] sm:$0xff]   ;;  %v691_v3 = vld [vmem:[#allocation5 + $0x8] sm:$0xff]  }
  0x5c   :  { %613 = vmatprep.subr.bf16.mxu0 %v843_v1  ;;  %617 = vmatprep.mubr.msk.bf16.mxu0 %vm844_vm0, %v843_v1  ;;  %v107_v4 = vld [vmem:[#allocation3] sm:$0xff]  ;;  %v692_v5 = vld [vmem:[#allocation7] sm:$0xff]   ;;  %vm132_vm1 = vcmask 261120   ;;  %v694_v8 = vld [vmem:[#allocation7 + $0x10] sm:$0xff]   ;;  %vm540_vm2 = vcmask 7168  }
  0x5d   :  { %621 = vmatprep.subr.bf16.mxu1 %v843_v1  ;;  %637 = vmatprep.mubr.msk.bf16.mxu1 %vm844_vm0, %v843_v1  ;;  %v108_v6 = vpack.c.bf16 %v107_v4, %v107_v4  ;;  %v693_v7 = vld [vmem:[#allocation7 + $0x8] sm:$0xff]   ;;  %v695_v9 = vld [vmem:[#allocation7 + $0x18] sm:$0xff]   ;;  %v696_v10 = vld [vmem:[#allocation7 + $0x20] sm:$0xff]  }
  0x5e   :  { %614 = vmatpush3.bf16.msra.mxu0 %v690_v2  ;;  %622 = vmatpush3.bf16.msra.mxu1 %v692_v5  ;;  %v697_v11 = vld [vmem:[#allocation7 + $0x28] sm:$0xff]   ;;  %v698_v12 = vld [vmem:[#allocation7 + $0x30] sm:$0xff]   ;;  %v699_v13 = vld [vmem:[#allocation7 + $0x38] sm:$0xff]  }
  0x5f   :  { %615 = vmatprep.subr.bf16.mxu0 %v843_v1  ;;  %623 = vmatprep.subr.bf16.mxu1 %v843_v1  ;;  %v700_v14 = vld [vmem:[#allocation8] sm:$0xff]   ;;  %v701_v15 = vld [vmem:[#allocation8 + $0x8] sm:$0xff]   ;;  %v702_v16 = vld [vmem:[#allocation8 + $0x10] sm:$0xff]  }
  0x60   :  { %v703_v17 = vld [vmem:[#allocation8 + $0x18] sm:$0xff]   ;;  %v704_v18 = vld [vmem:[#allocation8 + $0x20] sm:$0xff]   ;;  %v705_v19 = vld [vmem:[#allocation8 + $0x28] sm:$0xff]  }
  0x61   :  { %v549_v20 = vld [vmem:[%s1034_s2] ss:$0 sm:$0xff]  ;;  %v706_v28 = vld [vmem:[#allocation8 + $0x30] sm:$0xff]   ;;  %v707_v29 = vld [vmem:[#allocation8 + $0x38] sm:$0xff]  }
  0x62   :  { %616 = vmatpush3.bf16.msra.mxu0 %v691_v3  ;;  %624 = vmatpush3.bf16.msra.mxu1 %v693_v7  ;;  %v708_v30 = vld [vmem:[#allocation10] sm:$0xff]   ;;  %v709_v31 = vld [vmem:[#allocation10 + $0x8] sm:$0xff]   ;;  %v710_v32 = vld [vmem:[#allocation10 + $0x10] sm:$0xff]  }
  0x63   :  { %641 = vmatprep.subr.bf16.mxu0 %v843_v1  ;;  %625 = vmatprep.subr.bf16.mxu1 %v843_v1  ;;  %v711_v33 = vld [vmem:[#allocation10 + $0x18] sm:$0xff]   ;;  %v712_v34 = vld [vmem:[#allocation10 + $0x20] sm:$0xff]   ;;  %v713_v35 = vld [vmem:[#allocation10 + $0x28] sm:$0xff]  }
  0x64   :  { %v553_v36 = vld [vmem:[%s1036_s4] ss:$0 sm:$0xff]  ;;  %v714_v44 = vld [vmem:[#allocation10 + $0x30] sm:$0xff]   ;;  %v715_v45 = vld [vmem:[#allocation10 + $0x38] sm:$0xff]  }
  0x65   :  { %618 = vmatmul.mubr.msk.bf16.vlgmr.msra.gmra.mrb[0].mxu0 %vm132_vm1, %v108_v6  ;;  %v562_v46 = vld [vmem:[%s1038_s6] ss:$0 sm:$0xff] }
  0x66   :  { %657 = vmatprep.mubr.msk.bf16.mxu0 %vm844_vm0, %v843_v1  ;;  %626 = vmatpush3.bf16.msra.mxu1 %v694_v8  ;;  %v571_v54 = vld [vmem:[%s1040_s8] ss:$0 sm:$0xff] }
  0x67   :  { %627 = vmatprep.subr.bf16.mxu1 %v843_v1  ;;  %642 = vmatpush3.bf16.msra.mxu0 %v700_v14  ;;  %v580_v59 = vld [vmem:[%s1041_s9] ss:$0 sm:$0xff] }
  0x68   :  { %643 = vmatprep.subr.bf16.mxu0 %v843_v1  ;;  %v581_v63 = vld [vmem:[#allocation2] ss:$0 sm:$0xff] }
  0x6a   :  { %628 = vmatpush3.bf16.msra.mxu1 %v695_v9 }
  0x6b   :  { %629 = vmatprep.subr.bf16.mxu1 %v843_v1  ;;  %644 = vmatpush3.bf16.msra.mxu0 %v701_v15 }
  0x6c   :  { %645 = vmatprep.subr.bf16.mxu0 %v843_v1 }
  0x6e   :  { %630 = vmatpush3.bf16.msra.mxu1 %v696_v10 }
  0x6f   :  { %631 = vmatprep.subr.bf16.mxu1 %v843_v1  ;;  %646 = vmatpush3.bf16.msra.mxu0 %v702_v16 }
  0x70   :  { %647 = vmatprep.subr.bf16.mxu0 %v843_v1 }
  0x72   :  { %632 = vmatpush3.bf16.msra.mxu1 %v697_v11 }
  0x73   :  { %633 = vmatprep.subr.bf16.mxu1 %v843_v1  ;;  %648 = vmatpush3.bf16.msra.mxu0 %v703_v17 }
  0x74   :  { %649 = vmatprep.subr.bf16.mxu0 %v843_v1 }
  0x76   :  { %634 = vmatpush3.bf16.msra.mxu1 %v698_v12 }
  0x77   :  { %635 = vmatprep.subr.bf16.mxu1 %v843_v1  ;;  %650 = vmatpush3.bf16.msra.mxu0 %v704_v18 }
  0x78   :  { %651 = vmatprep.subr.bf16.mxu0 %v843_v1 }
  0x7a   :  { %636 = vmatpush3.bf16.msra.mxu1 %v699_v13 }
  0x7b   :  { %661 = vmatprep.subr.bf16.mxu1 %v843_v1  ;;  %652 = vmatpush3.bf16.msra.mxu0 %v705_v19 }
  0x7c   :  { %653 = vmatprep.subr.bf16.mxu0 %v843_v1 }
  0x7f   :  { %654 = vmatpush3.bf16.msra.mxu0 %v706_v28 }
  0x80   :  { %655 = vmatprep.subr.bf16.mxu0 %v843_v1 }
  0x83   :  { %656 = vmatpush3.bf16.msra.mxu0 %v707_v29 }
 0x138   :  { %v170_v21 = vpop.f32.mrb[0].mxu0 }
 0x139   :  { %v171_v22 = vadd.f32 %v549_v20, %v170_v21  ;;  %v619_v23 = vpop.f32.mrb[1].mxu0 }
 0x13a   :  { %v173_v24 = vpop.f32.mrb[2].mxu0 }
 0x13b   :  { %v176_v25 = vmax.f32 %v171_v22, 0.0  ;;  %v620_v26 = vpop.f32.mrb[3].mxu0 }
 0x13d   :  { %v177_v27 = vpack.c.bf16 %v176_v25, %v176_v25 }
 0x13f   :  { %638 = vmatmul.mubr.bf16.vlgmr.msra.gmra.mrb[0].mxu1 %v177_v27 }
 0x140   :  { %677 = vmatprep.mubr.msk.bf16.mxu1 %vm844_vm0, %v843_v1  ;;  %662 = vmatpush3.bf16.msra.mxu1 %v708_v30 }
 0x141   :  { %663 = vmatprep.subr.bf16.mxu1 %v843_v1 }
 0x144   :  { %664 = vmatpush3.bf16.msra.mxu1 %v709_v31 }
 0x145   :  { %665 = vmatprep.subr.bf16.mxu1 %v843_v1 }
 0x148   :  { %666 = vmatpush3.bf16.msra.mxu1 %v710_v32 }
 0x149   :  { %667 = vmatprep.subr.bf16.mxu1 %v843_v1 }
 0x14c   :  { %668 = vmatpush3.bf16.msra.mxu1 %v711_v33 }
 0x14d   :  { %669 = vmatprep.subr.bf16.mxu1 %v843_v1 }
 0x150   :  { %670 = vmatpush3.bf16.msra.mxu1 %v712_v34 }
 0x151   :  { %671 = vmatprep.subr.bf16.mxu1 %v843_v1 }
 0x154   :  { %672 = vmatpush3.bf16.msra.mxu1 %v713_v35 }
 0x155   :  { %673 = vmatprep.subr.bf16.mxu1 %v843_v1 }
 0x158   :  { %674 = vmatpush3.bf16.msra.mxu1 %v714_v44 }
 0x159   :  { %675 = vmatprep.subr.bf16.mxu1 %v843_v1 }
 0x15c   :  { %676 = vmatpush3.bf16.msra.mxu1 %v715_v45 }
 0x212   :  { %v283_v37 = vpop.f32.mrb[0].mxu1 }
 0x213   :  { %v284_v38 = vadd.f32 %v553_v36, %v283_v37  ;;  %v639_v39 = vpop.f32.mrb[1].mxu1 }
 0x214   :  { %v286_v40 = vpop.f32.mrb[2].mxu1 }
 0x215   :  { %v289_v41 = vmax.f32 %v284_v38, 0.0  ;;  %v640_v42 = vpop.f32.mrb[3].mxu1 }
 0x217   :  { %v290_v43 = vpack.c.bf16 %v289_v41, %v289_v41 }
 0x219   :  { %658 = vmatmul.mubr.bf16.vlgmr.msra.gmra.mrb[4].mxu0 %v290_v43 }
 0x2ec   :  { %v396_v47 = vpop.f32.mrb[4].mxu0 }
 0x2ed   :  { %v397_v48 = vadd.f32 %v562_v46, %v396_v47  ;;  %v659_v49 = vpop.f32.mrb[5].mxu0 }
 0x2ee   :  { %v399_v50 = vpop.f32.mrb[6].mxu0 }
 0x2ef   :  { %v402_v51 = vmax.f32 %v397_v48, 0.0  ;;  %v660_v52 = vpop.f32.mrb[7].mxu0 }
 0x2f1   :  { %v403_v53 = vpack.c.bf16 %v402_v51, %v402_v51 }
 0x2f3   :  { %678 = vmatmul.mubr.bf16.vlgmr.msra.gmra.mrb[4].mxu1 %v403_v53 }
 0x3c6   :  { %v509_v55 = vpop.f32.mrb[4].mxu1 }
 0x3c7   :  { %v510_v56 = vadd.f32 %v571_v54, %v509_v55  ;;  %v679_v57 = vpop.f32.mrb[5].mxu1 }
 0x3c8   :  { %v512_v58 = vpop.f32.mrb[6].mxu1 }
 0x3c9   :  { %v515_v60 = vmax.f32 %v510_v56, 0.0  ;;  %v680_v61 = vpop.f32.mrb[7].mxu1 }
 0x3cb   :  { %v523_v62 = vmul.f32 %v580_v59, %v515_v60 }
 0x3cd   :  { %524 = vadd.xlane.f32.xlu0 %v523_v62 }
 0x45a   :  { %v525_v0 = vpop.xlane.xlu0 %524 }
 0x45b   :  { %v533_v1 = vadd.f32 %v581_v63, %v525_v0 }
 0x45d   :  { %v582_v2 = vmul.f32 -1.442695, %v533_v1 }
 0x45f   :  { %716 = vpow2.f32 %v582_v2 }
 0x469   :  { %v717_v3 = vpop.eup %716 }
 0x46a   :  { %v537_v4 = vadd.f32 1.0, %v717_v3 }
 0x46c   :  { %718 = vrcp.f32 %v537_v4 }
 0x476   :  { %v719_v5 = vpop.eup %718 }
 0x477   :  { %541 = vst.msk [vmem:[%s1043_s11] sm:$0xff] %vm540_vm2, %v719_v5 }
 0x478   :  { %546 = vsyncpa [#allocation4], 1 }
 0x479   :  { %547 = vsyncpa [#allocation6], 1 }
 0x47a   :  { %548 = vsyncpa [#allocation9], 1 }

</bundles_post_ra>
